<compile_context>
chip_gen: v5e
topology: v5e:2x2
jax: 0.10.0
libtpu: 0.0.40
codegen_flags: <defaults>
</compile_context>

<pallas_src>
import jax
import jax.numpy as jnp
from jax.experimental import pallas as pl
from jax.experimental.pallas import tpu as pltpu

_CHUNK_BYTES = 8 * 1024 * 1024   # per-DMA chunk; HBM->HBM so zero VMEM cost
_LANE_CANDIDATES = (8192, 4096, 2048, 1024, 512, 256, 128)


def _lane_dense_2d(x):
    """Flatten to (rows, lanes) with lanes the widest multiple of 128 that divides."""
    total = x.size
    for lane in _LANE_CANDIDATES:
        if total % lane == 0:
            return x.reshape(total // lane, lane)
    # Odd element count: single-row view. Safe on the HBM->HBM DMA path
    # (one full-array DMA; never touches VMEM, so no OOM cliff).
    return x.reshape(1, total)


def _plan_chunks(rows, lanes, itemsize):
    """Row chunking: ~_CHUNK_BYTES per DMA, multiple-of-8 rows, >=2 chunks if possible."""
    row_bytes = max(lanes * itemsize, 1)
    chunk_rows = max(8, (_CHUNK_BYTES // row_bytes) // 8 * 8)
    chunk_rows = min(chunk_rows, rows)
    # v7x has 2 TensorCores: give the "parallel" grid axis at least 2 steps
    # whenever there is enough work to split (no effect on v5e/v6e).
    if rows // chunk_rows < 2 and rows >= 16:
        chunk_rows = max(8, ((rows // 2) // 8) * 8)
    n_full = rows // chunk_rows
    rem_rows = rows - n_full * chunk_rows
    n_steps = n_full + (1 if rem_rows else 0)
    return chunk_rows, n_full, rem_rows, n_steps


def _make_dma_copy_kernel(chunk_rows, n_full, rem_rows):
    """HBM->HBM chunked copy: each grid step DMAs one disjoint row slab."""

    def kernel(x_hbm, o_hbm, sem):
        i = pl.program_id(0)

        @pl.when(i < n_full)
        def _():
            start = i * chunk_rows
            cp = pltpu.make_async_copy(
                x_hbm.at[pl.ds(start, chunk_rows), :],
                o_hbm.at[pl.ds(start, chunk_rows), :],
                sem,
            )
            cp.start()
            cp.wait()

        if rem_rows:
            @pl.when(i == n_full)
            def _():
                start = n_full * chunk_rows
                cp = pltpu.make_async_copy(
                    x_hbm.at[pl.ds(start, rem_rows), :],
                    o_hbm.at[pl.ds(start, rem_rows), :],
                    sem,
                )
                cp.start()
                cp.wait()

    return kernel


def shape_forward(x):
    """Pallas equivalent of Shape.forward: prints shape (host side), returns x."""
    # Host-side side effect, mirroring PyTorch's `print(x.shape)`.
    # (Under jax.jit this fires once at trace time; use jax.debug.print if a
    #  per-call runtime print is required.)
    print(tuple(x.shape))

    if x.size == 0:
        return x

    orig_shape = x.shape
    x2d = _lane_dense_2d(x)
    rows, lanes = x2d.shape
    chunk_rows, n_full, rem_rows, n_steps = _plan_chunks(
        rows, lanes, x2d.dtype.itemsize
    )

    kernel = _make_dma_copy_kernel(chunk_rows, n_full, rem_rows)

    out2d = pl.pallas_call(
        kernel,
        out_shape=jax.ShapeDtypeStruct(x2d.shape, x2d.dtype),
        grid=(n_steps,),
        in_specs=[pl.BlockSpec(memory_space=pl.ANY)],   # raw HBM ref, no auto-DMA
        out_specs=pl.BlockSpec(memory_space=pl.ANY),    # raw HBM ref, no auto-DMA
        scratch_shapes=[pltpu.SemaphoreType.DMA(())],
        compiler_params=pltpu.CompilerParams(
            dimension_semantics=("parallel",),
        ),
    )(x2d)

    return out2d.reshape(orig_shape)


if __name__ == "__main__":
    key = jax.random.PRNGKey(0)
    # Small NCHW-style input consistent with a typical conv-net tensor.
    x = jax.random.normal(key, (2, 4, 16, 16), dtype=jnp.float32)

    y = shape_forward(x)
    y = jax.block_until_ready(y)

    # Sanity check: exact identity semantics.
    assert y.shape == x.shape
    assert y.dtype == x.dtype
    assert bool(jnp.all(y == x))

    print("KERNEL_OK")
</pallas_src>

<mosaic_0001>
module attributes {stable_mosaic.version = 11 : i64} {
  func.func @kernel(%arg0: i32, %arg1: memref<1x2048xf32, #tpu.memory_space<any>>, %arg2: memref<1x2048xf32, #tpu.memory_space<any>>, %arg3: memref<!tpu.dma_semaphore, #tpu.memory_space<semaphore_mem>>) attributes {dimension_semantics = [#tpu.dimension_semantics<parallel>], iteration_bounds = array<i64: 1>, scalar_prefetch = 0 : i64, scratch_operands = 1 : i64, tpu.core_type = #tpu.core_type<tc>, window_params = [{}, {}]} {
    %c1_i32 = arith.constant 1 : i32
    %0 = arith.cmpi slt, %arg0, %c1_i32 : i32
    %1 = arith.extui %0 : i1 to i32
    %c0_i32 = arith.constant 0 : i32
    %2 = arith.cmpi ne, %1, %c0_i32 : i32
    scf.if %2 {
      %c1_i32_0 = arith.constant 1 : i32
      %3 = arith.muli %arg0, %c1_i32_0 : i32
      %c0_i32_1 = arith.constant 0 : i32
      %4 = tpu.memref_slice %arg1[%3, %c0_i32_1] : memref<1x2048xf32, #tpu.memory_space<any>> -> memref<1x2048xf32, #tpu.memory_space<any>>
      %c0_i32_2 = arith.constant 0 : i32
      %5 = tpu.memref_slice %arg2[%3, %c0_i32_2] : memref<1x2048xf32, #tpu.memory_space<any>> -> memref<1x2048xf32, #tpu.memory_space<any>>
      tpu.enqueue_dma source(%4 : memref<1x2048xf32, #tpu.memory_space<any>>) target(%5 : memref<1x2048xf32, #tpu.memory_space<any>>) target_semaphore(%arg3 : memref<!tpu.dma_semaphore, #tpu.memory_space<semaphore_mem>>)
      %c0_i32_3 = arith.constant 0 : i32
      %6 = tpu.memref_slice %arg1[%3, %c0_i32_3] : memref<1x2048xf32, #tpu.memory_space<any>> -> memref<1x2048xf32, #tpu.memory_space<any>>
      %c0_i32_4 = arith.constant 0 : i32
      %7 = tpu.memref_slice %arg2[%3, %c0_i32_4] : memref<1x2048xf32, #tpu.memory_space<any>> -> memref<1x2048xf32, #tpu.memory_space<any>>
      tpu.wait_dma2 semaphore(%arg3 : memref<!tpu.dma_semaphore, #tpu.memory_space<semaphore_mem>>) src(%6 : memref<1x2048xf32, #tpu.memory_space<any>>) dst(%7 : memref<1x2048xf32, #tpu.memory_space<any>>)
    } else {
    }
    return
  }
}

</mosaic_0001>

<bundles_post_ra>
// kernel: tpu_custom_call.1
= control target key start
LH: loop header
LB: loop body
LE: loop exit
PB: predicated region body
PF: predicated region fallthrough
CT: control target
= control target key end

     0   :  { %s39_s12 = smov [#allocation2]   ;;  %s40_s13 = smov [#allocation3]   ;;  %s58_s0 = inlined_call_operand.hbm [shape: f32[1,2048], index: 0, kind: input, shape index: {}]   ;;  %s59_s1 = inlined_call_operand.hbm [shape: f32[1,2048], index: 1, kind: output, shape index: {}]  }
   0x1   :  { %s17_s8 = sshll.u32 %s58_s0, 4  ;;  %s19_s11 = sshll.u32 %s59_s1, 4  ;;  %s18_s8 = int_to_ptr.hbm [resolvable:$true] %s17_s8  ;;  %s20_s11 = int_to_ptr.hbm [resolvable:$true] %s19_s11 }
   0x2   :  { %s41_s14 = smov 0  }
   0x3   :  { %23 = dma.general %s18_s8, 256, %s20_s11, %s39_s12, %s40_s13, [#allocation4], %s41_s14, 0  }
   0x4   :  { %37 = dma.done.wait [#allocation2], 256 }
   0x5   :  { %38 = vsyncadd [#allocation2], 4294967040 }
   0x6   :  { %27 = vsyncmov [#allocation2] }
   0x9   :  { %s28_s15 = vpop.sfrf %27 }
   0xa   :  { %p33_p0 = scmp.ne.s32.totalorder %s28_s15, 0 }
   0xc   :  { %32 = shalt.err (%p33_p0)  }

</bundles_post_ra>
